<compile_context>
chip_gen: v7x
topology: tpu7x:2x2x1
jax: 0.10.0
libtpu: 0.0.40
codegen_flags: <defaults>
</compile_context>

<pallas_src>
import functools

import jax
import jax.numpy as jnp
from jax.experimental import pallas as pl
from jax.experimental.pallas import tpu as pltpu


_GELU_C = 0.7978845608028654  # sqrt(2/pi)


def mlp_kernel(x_ref, wfc_ref, bfc_ref, wproj_ref, bproj_ref, o_ref, acc_ref,
               *, gelu_dtype):
    # x_ref:     (tm, n_embd)   compute dtype, resident across the k axis
    # wfc_ref:   (n_embd, th)   compute dtype, hidden slice (or full hidden)
    # bfc_ref:   (1, th)        f32
    # wproj_ref: (th, n_embd)   compute dtype
    # bproj_ref: (1, n_embd)    f32
    # o_ref:     (tm, n_embd)   x.dtype, written only at the last hidden tile
    # acc_ref:   (tm, n_embd)   f32 accumulator scratch
    k = pl.program_id(1)

    @pl.when(k == 0)
    def _init():
        acc_ref[...] = jnp.zeros_like(acc_ref)

    # c_fc for this hidden slice (MXU, f32 accumulate) + bias.
    h = jnp.dot(x_ref[...], wfc_ref[...], preferred_element_type=jnp.float32)
    h = (h + bfc_ref[...]).astype(gelu_dtype)

    # GELU, tanh approximation (matches nn.GELU(approximate='tanh')).
    # h * 0.5 * (1 + tanh(c * (h + 0.044715*h^3))), cubic folded as h*(1+a*h*h).
    hh = h * h
    inner = _GELU_C * h * (1.0 + 0.044715 * hh)
    g = h * (0.5 + 0.5 * jnp.tanh(inner))

    # Partial c_proj contribution of this hidden slice, accumulated in f32.
    acc_ref[...] += jnp.dot(g.astype(wproj_ref.dtype), wproj_ref[...],
                            preferred_element_type=jnp.float32)

    @pl.when(k == pl.num_programs(1) - 1)
    def _finalize():
        o_ref[...] = (acc_ref[...] + bproj_ref[...]).astype(o_ref.dtype)


def _round_up(x, m):
    return (x + m - 1) // m * m


def _pick_th(hidden_pad, th_cap):
    """Largest multiple of 128 dividing hidden_pad, not exceeding th_cap."""
    q = hidden_pad // 128
    best = 1
    for d in range(1, min(q, max(1, th_cap // 128)) + 1):
        if q % d == 0:
            best = d
    return best * 128


def _vmem_cap_bytes():
    phys = 64 * 1024 * 1024  # conservative fallback (v7x per-TC VMEM)
    try:
        info = pltpu.get_tpu_info()
        phys = int(getattr(info, "vmem_capacity_bytes", phys) or phys)
    except Exception:
        pass
    # Leave headroom; never ask for more than ~100 MiB even on 128 MiB parts.
    return int(min(phys * 3 // 4, 100 * 1024 * 1024))


def _est_vmem(tm, th, n_embd, cb, ob):
    # Double-buffered in/out blocks + f32 accumulator + GELU intermediates
    # (h in f32, g in gelu dtype ~= compute dtype, g cast for the MXU).
    buf = (tm * n_embd * cb + n_embd * th * cb + th * 4
           + th * n_embd * cb + n_embd * 4 + tm * n_embd * ob)
    inter = tm * th * (4 + cb + cb)
    return 2 * buf + tm * n_embd * 4 + inter


def prepare_mlp_params(w_fc, b_fc, w_proj, b_proj, compute_dtype=jnp.bfloat16):
    """Transpose PyTorch [out, in] weights to [in, out] once, cast for the MXU,
    and zero-pad the hidden dim to a multiple of 128 (exact: gelu(0)=0 and
    zero W_proj rows contribute nothing)."""
    wfc_t = jnp.asarray(w_fc).T.astype(compute_dtype)        # (n_embd, hidden)
    wproj_t = jnp.asarray(w_proj).T.astype(compute_dtype)    # (hidden, n_embd)
    bfc = jnp.asarray(b_fc).reshape(1, -1).astype(jnp.float32)
    bproj = jnp.asarray(b_proj).reshape(1, -1).astype(jnp.float32)

    hidden = wfc_t.shape[1]
    hidden_pad = _round_up(hidden, 128)
    if hidden_pad != hidden:
        pad_h = hidden_pad - hidden
        wfc_t = jnp.pad(wfc_t, ((0, 0), (0, pad_h)))
        bfc = jnp.pad(bfc, ((0, 0), (0, pad_h)))
        wproj_t = jnp.pad(wproj_t, ((0, pad_h), (0, 0)))
    return wfc_t, bfc, wproj_t, bproj


def mlp_pallas(x, wfc_t, bfc, wproj_t, bproj, *, tm_max=1024, th_max=1024,
               compute_dtype=jnp.bfloat16, gelu_dtype=None):
    """x: [B, T, n_embd]. wfc_t: [n_embd, H], wproj_t: [H, n_embd] (prepared)."""
    B, T, n_embd = x.shape
    hidden_pad = wfc_t.shape[1]
    if hidden_pad % 128 != 0:  # safety if params weren't prepared
        pad_h = _round_up(hidden_pad, 128) - hidden_pad
        wfc_t = jnp.pad(wfc_t, ((0, 0), (0, pad_h)))
        bfc = jnp.pad(bfc, ((0, 0), (0, pad_h)))
        wproj_t = jnp.pad(wproj_t, ((0, pad_h), (0, 0)))
        hidden_pad += pad_h
    M = B * T

    out_dtype = x.dtype
    gelu_dtype = compute_dtype if gelu_dtype is None else gelu_dtype
    cb = jnp.dtype(compute_dtype).itemsize
    ob = jnp.dtype(out_dtype).itemsize

    # Row tile: big (>= machine balance in FLOPs/weight-byte), sublane-packed.
    sub = 16 if cb < 4 else 8
    tm = int(min(tm_max, _round_up(M, sub)))
    if tm >= 256:
        tm = int(min(tm_max, _round_up(tm, 256)))
    # Megacore: prefer >=2 row tiles when there is enough work to split.
    while tm >= 512 and _round_up(M, tm) // tm < 2:
        tm //= 2

    cap = _vmem_cap_bytes()
    # Hidden tile: full hidden (weights VMEM-resident) when the budget allows,
    # otherwise stream large lane-aligned slices.
    if _est_vmem(tm, hidden_pad, n_embd, cb, ob) <= cap:
        th = hidden_pad
    else:
        th = _pick_th(hidden_pad, th_max)
    while _est_vmem(tm, th, n_embd, cb, ob) > cap and th > 128:
        th = _pick_th(hidden_pad, th - 128)
    while _est_vmem(tm, th, n_embd, cb, ob) > cap and tm > 2 * sub:
        tm = max(sub, (tm // 2 // sub) * sub)
    M_pad = _round_up(M, tm)

    x2d = x.reshape(M, n_embd).astype(compute_dtype)
    if M_pad != M:
        x2d = jnp.pad(x2d, ((0, M_pad - M), (0, 0)))
    wfc_t = wfc_t.astype(compute_dtype)
    wproj_t = wproj_t.astype(compute_dtype)

    grid = (M_pad // tm, hidden_pad // th)

    est = _est_vmem(tm, th, n_embd, cb, ob)
    vmem_limit = int(min(cap, max(est + (4 << 20), 32 << 20)))

    cost = pl.CostEstimate(
        flops=int(4 * M * n_embd * hidden_pad),      # two matmuls, 2*M*N*K each
        transcendentals=int(M * hidden_pad),         # tanh per hidden activation
        bytes_accessed=int(M * n_embd * (cb + ob)
                           + grid[0] * 2 * n_embd * hidden_pad * cb
                           + (hidden_pad + n_embd) * 4),
    )

    kernel = functools.partial(mlp_kernel, gelu_dtype=gelu_dtype)

    out2d = pl.pallas_call(
        kernel,
        out_shape=jax.ShapeDtypeStruct((M_pad, n_embd), out_dtype),
        grid_spec=pltpu.PrefetchScalarGridSpec(
            num_scalar_prefetch=0,
            grid=grid,
            in_specs=[
                pl.BlockSpec((tm, n_embd), lambda i, k: (i, 0)),   # x rows (resident over k)
                pl.BlockSpec((n_embd, th), lambda i, k: (0, k)),   # W_fc^T hidden slice
                pl.BlockSpec((1, th), lambda i, k: (0, k)),        # b_fc hidden slice
                pl.BlockSpec((th, n_embd), lambda i, k: (k, 0)),   # W_proj^T hidden slice
                pl.BlockSpec((1, n_embd), lambda i, k: (0, 0)),    # b_proj (full)
            ],
            out_specs=pl.BlockSpec((tm, n_embd), lambda i, k: (i, 0)),
            scratch_shapes=[pltpu.VMEM((tm, n_embd), jnp.float32)],
        ),
        compiler_params=pltpu.CompilerParams(
            dimension_semantics=("parallel", "arbitrary"),
            vmem_limit_bytes=vmem_limit,
        ),
        cost_estimate=cost,
    )(x2d, wfc_t, bfc, wproj_t, bproj)

    return out2d[:M].reshape(B, T, n_embd)


def mlp_reference(x, w_fc, b_fc, w_proj, b_proj):
    h = jnp.einsum("btn,hn->bth", x, w_fc) + b_fc
    g = 0.5 * h * (1.0 + jnp.tanh(_GELU_C * (h + 0.044715 * h ** 3)))
    return jnp.einsum("bth,nh->btn", g, w_proj) + b_proj


if __name__ == "__main__":
    key = jax.random.PRNGKey(0)

    # ---- Small GPT-2-style shapes: B=2, T=8, n_embd=32, hidden=128 ----
    B, T, n_embd = 2, 8, 32
    hidden = 4 * n_embd
    kx, k1, k2, k3, k4, k5 = jax.random.split(key, 6)

    x = jax.random.normal(kx, (B, T, n_embd), dtype=jnp.float32)
    # PyTorch nn.Linear parameter layouts: weight [out, in], bias [out]
    w_fc = jax.random.normal(k1, (hidden, n_embd), dtype=jnp.float32) * 0.02
    b_fc = jax.random.normal(k2, (hidden,), dtype=jnp.float32) * 0.02
    w_proj = jax.random.normal(k3, (n_embd, hidden), dtype=jnp.float32) * 0.02
    b_proj = jax.random.normal(k4, (n_embd,), dtype=jnp.float32) * 0.02

    ref = mlp_reference(x, w_fc, b_fc, w_proj, b_proj)

    # f32 compute path: tight check against the reference.
    params_f32 = prepare_mlp_params(w_fc, b_fc, w_proj, b_proj,
                                    compute_dtype=jnp.float32)
    out_f32 = mlp_pallas(x, *params_f32, compute_dtype=jnp.float32)
    jax.block_until_ready(out_f32)
    assert out_f32.shape == (B, T, n_embd)
    assert jnp.allclose(out_f32, ref, atol=1e-4, rtol=1e-4)

    # bf16 compute path (default / performance config): looser tolerance.
    params_bf16 = prepare_mlp_params(w_fc, b_fc, w_proj, b_proj,
                                     compute_dtype=jnp.bfloat16)
    out_bf16 = mlp_pallas(x, *params_bf16, compute_dtype=jnp.bfloat16)
    jax.block_until_ready(out_bf16)
    assert out_bf16.shape == (B, T, n_embd)
    assert jnp.allclose(out_bf16, ref, atol=1e-2, rtol=1e-2)

    # ---- Non-aligned shapes: exercises row + hidden zero-padding paths ----
    B2, T2, n_embd2 = 3, 40, 48
    hidden2 = 4 * n_embd2  # 192 -> padded to 256 in prepare_mlp_params
    kx2, k6, k7, k8, k9 = jax.random.split(k5, 5)
    x2 = jax.random.normal(kx2, (B2, T2, n_embd2), dtype=jnp.float32)
    w_fc2 = jax.random.normal(k6, (hidden2, n_embd2), dtype=jnp.float32) * 0.02
    b_fc2 = jax.random.normal(k7, (hidden2,), dtype=jnp.float32) * 0.02
    w_proj2 = jax.random.normal(k8, (n_embd2, hidden2), dtype=jnp.float32) * 0.02
    b_proj2 = jax.random.normal(k9, (n_embd2,), dtype=jnp.float32) * 0.02

    ref2 = mlp_reference(x2, w_fc2, b_fc2, w_proj2, b_proj2)
    params2 = prepare_mlp_params(w_fc2, b_fc2, w_proj2, b_proj2,
                                 compute_dtype=jnp.float32)
    out2 = mlp_pallas(x2, *params2, compute_dtype=jnp.float32)
    jax.block_until_ready(out2)
    assert out2.shape == (B2, T2, n_embd2)
    assert jnp.allclose(out2, ref2, atol=1e-4, rtol=1e-4)

    print("KERNEL_OK")
</pallas_src>

<mosaic_0001>
module attributes {stable_mosaic.version = 11 : i64} {
  func.func @mlp_kernel(%arg0: i32, %arg1: i32, %arg2: memref<16x32xf32, #tpu.memory_space<vmem>>, %arg3: memref<32x128xf32, #tpu.memory_space<vmem>>, %arg4: memref<1x128xf32, #tpu.memory_space<vmem>>, %arg5: memref<128x32xf32, #tpu.memory_space<vmem>>, %arg6: memref<1x32xf32, #tpu.memory_space<vmem>>, %arg7: memref<16x32xf32, #tpu.memory_space<vmem>>, %arg8: memref<16x32xf32, #tpu.memory_space<vmem>>) attributes {dimension_semantics = [#tpu.dimension_semantics<parallel>, #tpu.dimension_semantics<arbitrary>], iteration_bounds = array<i64: 1, 1>, scalar_prefetch = 0 : i64, scratch_operands = 1 : i64, tpu.core_type = #tpu.core_type<tc>, window_params = [{transform_indices = @transform_0, window_bounds = array<i64: 16, 32>}, {transform_indices = @transform_1, window_bounds = array<i64: 32, 128>}, {transform_indices = @transform_2, window_bounds = array<i64: 1, 128>}, {transform_indices = @transform_3, window_bounds = array<i64: 128, 32>}, {pipeline_mode = #tpu.pipeline_mode<synchronous>, transform_indices = @transform_4, window_bounds = array<i64: 1, 32>}, {transform_indices = @transform_5, window_bounds = array<i64: 16, 32>}]} {
    %c0_i32 = arith.constant 0 : i32
    %0 = arith.cmpi eq, %arg1, %c0_i32 : i32
    %1 = arith.extui %0 : i1 to i32
    %c0_i32_0 = arith.constant 0 : i32
    %2 = arith.cmpi ne, %1, %c0_i32_0 : i32
    scf.if %2 {
      %cst_20 = arith.constant 0.000000e+00 : f32
      %31 = vector.broadcast %cst_20 : f32 to vector<16x32xf32>
      %c0_21 = arith.constant 0 : index
      %c0_22 = arith.constant 0 : index
      %32 = vector.load %arg8[%c0_21, %c0_22] : memref<16x32xf32, #tpu.memory_space<vmem>>, vector<16x32xf32>
      tpu.vector_store %arg8[%c0_21, %c0_22], %31 {strides = array<i32>} : memref<16x32xf32, #tpu.memory_space<vmem>>, vector<16x32xf32>,
    } else {
    }
    %c0 = arith.constant 0 : index
    %c0_1 = arith.constant 0 : index
    %3 = vector.load %arg2[%c0, %c0_1] : memref<16x32xf32, #tpu.memory_space<vmem>>, vector<16x32xf32>
    %c0_2 = arith.constant 0 : index
    %c0_3 = arith.constant 0 : index
    %4 = vector.load %arg3[%c0_2, %c0_3] : memref<32x128xf32, #tpu.memory_space<vmem>>, vector<32x128xf32>
    %cst = arith.constant dense<0.000000e+00> : vector<16x128xf32>
    %5 = tpu.matmul %3, %4, %cst {dimension_numbers = #tpu.dot_dimension_numbers<[1], [0], [0], [1], [0, 0, 1, 1], [], []>} : vector<16x32xf32>, vector<32x128xf32>, vector<16x128xf32> -> vector<16x128xf32>
    %c0_4 = arith.constant 0 : index
    %c0_5 = arith.constant 0 : index
    %6 = vector.load %arg4[%c0_4, %c0_5] : memref<1x128xf32, #tpu.memory_space<vmem>>, vector<1x128xf32>
    %7 = vector.broadcast %6 : vector<1x128xf32> to vector<16x128xf32>
    %8 = arith.addf %5, %7 : vector<16x128xf32>
    %9 = arith.mulf %8, %8 : vector<16x128xf32>
    %cst_6 = arith.constant 0.797884583 : f32
    %10 = vector.broadcast %cst_6 : f32 to vector<16x128xf32>
    %11 = arith.mulf %10, %8 : vector<16x128xf32>
    %cst_7 = arith.constant 4.471500e-02 : f32
    %12 = vector.broadcast %cst_7 : f32 to vector<16x128xf32>
    %13 = arith.mulf %12, %9 : vector<16x128xf32>
    %cst_8 = arith.constant 1.000000e+00 : f32
    %14 = vector.broadcast %cst_8 : f32 to vector<16x128xf32>
    %15 = arith.addf %14, %13 : vector<16x128xf32>
    %16 = arith.mulf %11, %15 : vector<16x128xf32>
    %17 = math.tanh %16 : vector<16x128xf32>
    %cst_9 = arith.constant 5.000000e-01 : f32
    %18 = vector.broadcast %cst_9 : f32 to vector<16x128xf32>
    %19 = arith.mulf %18, %17 : vector<16x128xf32>
    %cst_10 = arith.constant 5.000000e-01 : f32
    %20 = vector.broadcast %cst_10 : f32 to vector<16x128xf32>
    %21 = arith.addf %20, %19 : vector<16x128xf32>
    %22 = arith.mulf %8, %21 : vector<16x128xf32>
    %c0_11 = arith.constant 0 : index
    %c0_12 = arith.constant 0 : index
    %23 = vector.load %arg8[%c0_11, %c0_12] : memref<16x32xf32, #tpu.memory_space<vmem>>, vector<16x32xf32>
    %c0_13 = arith.constant 0 : index
    %c0_14 = arith.constant 0 : index
    %24 = vector.load %arg5[%c0_13, %c0_14] : memref<128x32xf32, #tpu.memory_space<vmem>>, vector<128x32xf32>
    %cst_15 = arith.constant dense<0.000000e+00> : vector<16x32xf32>
    %25 = tpu.matmul %22, %24, %cst_15 {dimension_numbers = #tpu.dot_dimension_numbers<[1], [0], [0], [1], [0, 0, 1, 1], [], []>} : vector<16x128xf32>, vector<128x32xf32>, vector<16x32xf32> -> vector<16x32xf32>
    %26 = arith.addf %23, %25 : vector<16x32xf32>
    %c0_16 = arith.constant 0 : index
    %c0_17 = arith.constant 0 : index
    %27 = vector.load %arg8[%c0_16, %c0_17] : memref<16x32xf32, #tpu.memory_space<vmem>>, vector<16x32xf32>
    tpu.vector_store %arg8[%c0_16, %c0_17], %26 {strides = array<i32>} : memref<16x32xf32, #tpu.memory_space<vmem>>, vector<16x32xf32>,
    %c0_i32_18 = arith.constant 0 : i32
    %28 = arith.cmpi eq, %arg1, %c0_i32_18 : i32
    %29 = arith.extui %28 : i1 to i32
    %c0_i32_19 = arith.constant 0 : i32
    %30 = arith.cmpi ne, %29, %c0_i32_19 : i32
    scf.if %30 {
      %c0_20 = arith.constant 0 : index
      %c0_21 = arith.constant 0 : index
      %31 = vector.load %arg8[%c0_20, %c0_21] : memref<16x32xf32, #tpu.memory_space<vmem>>, vector<16x32xf32>
      %c0_22 = arith.constant 0 : index
      %c0_23 = arith.constant 0 : index
      %32 = vector.load %arg6[%c0_22, %c0_23] : memref<1x32xf32, #tpu.memory_space<vmem>>, vector<1x32xf32>
      %33 = vector.broadcast %32 : vector<1x32xf32> to vector<16x32xf32>
      %34 = arith.addf %31, %33 : vector<16x32xf32>
      %c0_24 = arith.constant 0 : index
      %c0_25 = arith.constant 0 : index
      %35 = vector.load %arg7[%c0_24, %c0_25] : memref<16x32xf32, #tpu.memory_space<vmem>>, vector<16x32xf32>
      tpu.vector_store %arg7[%c0_24, %c0_25], %34 {strides = array<i32>} : memref<16x32xf32, #tpu.memory_space<vmem>>, vector<16x32xf32>,
    } else {
    }
    return
  }
  func.func @transform_0(%arg0: i32, %arg1: i32) -> (i32, i32) {
    %c0_i32 = arith.constant 0 : i32
    %c0_i32_0 = arith.constant 0 : i32
    return %arg0, %c0_i32 : i32, i32
  }
  func.func @transform_1(%arg0: i32, %arg1: i32) -> (i32, i32) {
    %c0_i32 = arith.constant 0 : i32
    %c0_i32_0 = arith.constant 0 : i32
    return %c0_i32, %arg1 : i32, i32
  }
  func.func @transform_2(%arg0: i32, %arg1: i32) -> (i32, i32) {
    %c0_i32 = arith.constant 0 : i32
    %c0_i32_0 = arith.constant 0 : i32
    return %c0_i32, %arg1 : i32, i32
  }
  func.func @transform_3(%arg0: i32, %arg1: i32) -> (i32, i32) {
    %c0_i32 = arith.constant 0 : i32
    %c0_i32_0 = arith.constant 0 : i32
    return %arg1, %c0_i32 : i32, i32
  }
  func.func @transform_4(%arg0: i32, %arg1: i32) -> (i32, i32) {
    %c0_i32 = arith.constant 0 : i32
    %c0_i32_0 = arith.constant 0 : i32
    %c0_i32_1 = arith.constant 0 : i32
    return %c0_i32, %c0_i32_0 : i32, i32
  }
  func.func @transform_5(%arg0: i32, %arg1: i32) -> (i32, i32) {
    %c0_i32 = arith.constant 0 : i32
    %c0_i32_0 = arith.constant 0 : i32
    return %arg0, %c0_i32 : i32, i32
  }
}

</mosaic_0001>

<bundles_post_ra>
// kernel: tpu_custom_call.1
= control target key start
LH: loop header
LB: loop body
LE: loop exit
PB: predicated region body
PF: predicated region fallthrough
CT: control target
= control target key end

     0   :  { %vm25_vm0 = vcmask 261120   ;;  %s542_s0 = inlined_call_operand.vmem [shape: f32[16,32], index: 0, kind: input, shape index: {}]   ;;  %s543_s1 = inlined_call_operand.vmem [shape: f32[32,128], index: 1, kind: input, shape index: {}]   ;;  %s544_s2 = inlined_call_operand.vmem [shape: f32[1,128], index: 2, kind: input, shape index: {}]   ;;  %s545_s3 = inlined_call_operand.vmem [shape: f32[128,32], index: 3, kind: input, shape index: {}]   ;;  %s546_s4 = inlined_call_operand.vmem [shape: f32[1,32], index: 4, kind: input, shape index: {}]   ;;  %s547_s5 = inlined_call_operand.hbm [shape: f32[16,32], index: 5, kind: output, shape index: {}]  }
   0x1   :  { %v30_v0 = vld [vmem:[%s543_s1] sm:$0xff]  ;;  %v31_v1 = vld [vmem:[%s543_s1 + $0x8] sm:$0xff]  ;;  %v32_v2 = vld [vmem:[%s543_s1 + $0x10] sm:$0xff] }
   0x2   :  { %v344_v3 = vpack.c.bf16 %v31_v1, %v30_v0  ;;  %v33_v4 = vld [vmem:[%s543_s1 + $0x18] sm:$0xff]  ;;  %v28_v5 = vld [vmem:[%s542_s0] sm:$0xff]  ;;  %v144_v8 = vld [vmem:[%s545_s3 + $0x8] sm:$0xff] }
   0x3   :  { %v348_v6 = vpack.c.bf16 %v33_v4, %v32_v2  ;;  %306 = vmatprep.mubr.msk.f32.mxu0 %vm25_vm0, %v28_v5  ;;  %v143_v7 = vld [vmem:[%s545_s3] sm:$0xff] }
   0x4   :  { %10 = vsyncpa [#allocation4], 0  ;;  %345 = vmatprep.subr.bf16.mxu0 %v344_v3  ;;  %v352_v9 = vpack.c.bf16 %v144_v8, %v143_v7  ;;  %v29_v10 = vld [vmem:[%s542_s0 + $0x8] sm:$0xff]  ;;  %v145_v11 = vld [vmem:[%s545_s3 + $0x10] sm:$0xff]  ;;  %v416_v32 = vmov 0.0   ;;  %s417_s11 = smov [#allocation3]  }
   0x5   :  { %347 = vmatpush3.bf16.msra.mxu0 %v344_v3  ;;  %v146_v12 = vld [vmem:[%s545_s3 + $0x18] sm:$0xff]  ;;  %v147_v14 = vld [vmem:[%s545_s3 + $0x20] sm:$0xff]  ;;  %v148_v15 = vld [vmem:[%s545_s3 + $0x28] sm:$0xff]  ;;  %27 = vst.msk [vmem:[#allocation2 + $0x8] sm:$0xff] %vm25_vm0, %v416_v32  ;;  %s259_s12 = sshll.u32 %s417_s11, 4  ;;  %s260_s12 = int_to_ptr.vmem [resolvable:$true] %s259_s12 }
   0x6   :  { %349 = vmatprep.subr.bf16.mxu0 %v348_v6  ;;  %353 = vmatprep.subr.bf16.mxu1 %v352_v9  ;;  %v356_v13 = vpack.c.bf16 %v146_v12, %v145_v11  ;;  %v360_v16 = vpack.c.bf16 %v148_v15, %v147_v14  ;;  %v149_v17 = vld [vmem:[%s545_s3 + $0x30] sm:$0xff]  ;;  %v150_v18 = vld [vmem:[%s545_s3 + $0x38] sm:$0xff]  ;;  %v151_v20 = vld [vmem:[%s545_s3 + $0x40] sm:$0xff]  ;;  %26 = vst.msk [vmem:[#allocation2] sm:$0xff] %vm25_vm0, %v416_v32  ;;  %s392_s13 = scalar_lea.vmem %s260_s12, 256  ;;  %p397_p1 = scmp.lt.s32.totalorder %s260_s12, %s260_s12 }
   0x7   :  { %355 = vmatpush3.bf16.msra.mxu1 %v352_v9  ;;  %v364_v19 = vpack.c.bf16 %v150_v18, %v149_v17  ;;  %v152_v21 = vld [vmem:[%s545_s3 + $0x48] sm:$0xff]  ;;  %v153_v22 = vld [vmem:[%s545_s3 + $0x50] sm:$0xff]  ;;  %v154_v24 = vld [vmem:[%s545_s3 + $0x58] sm:$0xff]  ;;  %p393_p0 = scmp.ne.s32.totalorder %s260_s12, %s392_s13  ;;  %p398_p2 = scmp.lt.s32.totalorder %s392_s13, %s392_s13 }
   0x8   :  { %357 = vmatprep.subr.bf16.mxu1 %v356_v13  ;;  %v368_v23 = vpack.c.bf16 %v152_v21, %v151_v20  ;;  %v372_v25 = vpack.c.bf16 %v154_v24, %v153_v22  ;;  %v155_v26 = vld [vmem:[%s545_s3 + $0x60] sm:$0xff]  ;;  %v156_v27 = vld [vmem:[%s545_s3 + $0x68] sm:$0xff]  ;;  %v157_v29 = vld [vmem:[%s545_s3 + $0x70] sm:$0xff] }
   0x9   :  { %351 = vmatpush3.bf16.msra.mxu0 %v348_v6  ;;  %v376_v28 = vpack.c.bf16 %v156_v27, %v155_v26  ;;  %v158_v30 = vld [vmem:[%s545_s3 + $0x78] sm:$0xff]  ;;  %v270_v33 = vld [vmem:[%s544_s2] ss:$0 sm:$0xff]  ;;  %p399_p3 = por %p398_p2, %p397_p1 }
   0xa   :  { %v380_v31 = vpack.c.bf16 %v158_v30, %v157_v29  ;;  %v273_v62 = vld [vmem:[%s546_s4] ss:$0 sm:$0xff] }
   0xb   :  { %359 = vmatpush3.bf16.msra.mxu1 %v356_v13  ;;  %p400_p4 = pnand %p399_p3, %p393_p0 }
   0xc   :  { %307 = vmatmul.mubr.msk.f32.vlgmr.msra.gmra.mrb[0].mxu0 %vm25_vm0, %v29_v10  ;;  %361 = vmatprep.subr.bf16.mxu1 %v360_v16  ;;  %v142_v56 = vld [vmem:[#allocation2 + $0x8] sm:$0xff] }
   0xd   :  { %v141_v57 = vld [vmem:[#allocation2] sm:$0xff] }
   0xf   :  { %363 = vmatpush3.bf16.msra.mxu1 %v360_v16 }
  0x10   :  { %365 = vmatprep.subr.bf16.mxu1 %v364_v19 }
  0x13   :  { %367 = vmatpush3.bf16.msra.mxu1 %v364_v19 }
  0x14   :  { %369 = vmatprep.subr.bf16.mxu1 %v368_v23 }
  0x17   :  { %371 = vmatpush3.bf16.msra.mxu1 %v368_v23 }
  0x18   :  { %373 = vmatprep.subr.bf16.mxu1 %v372_v25 }
  0x1b   :  { %375 = vmatpush3.bf16.msra.mxu1 %v372_v25 }
  0x1c   :  { %377 = vmatprep.subr.bf16.mxu1 %v376_v28 }
  0x1f   :  { %379 = vmatpush3.bf16.msra.mxu1 %v376_v28 }
  0x20   :  { %381 = vmatprep.subr.bf16.mxu1 %v380_v31 }
  0x23   :  { %383 = vmatpush3.bf16.msra.mxu1 %v380_v31 }
  0xdf   :  { %v308_v34 = vpop.f32.mrb[0].mxu0 }
  0xe0   :  { %v120_v35 = vadd.f32 %v308_v34, %v270_v33  ;;  %v114_v36 = vpop.f32.mrb[1].mxu0 }
  0xe1   :  { %v115_v37 = vadd.f32 %v270_v33, %v114_v36 }
  0xe2   :  { %v124_v38 = vmul.f32 %v120_v35, %v120_v35  ;;  %v126_v42 = vmul.f32 0.7978846, %v120_v35 }
  0xe3   :  { %v123_v39 = vmul.f32 %v115_v37, %v115_v37  ;;  %v125_v44 = vmul.f32 0.7978846, %v115_v37 }
  0xe4   :  { %v128_v40 = vmul.f32 0.044715, %v124_v38 }
  0xe5   :  { %v127_v41 = vmul.f32 0.044715, %v123_v39 }
  0xe6   :  { %v130_v43 = vadd.f32 1.0, %v128_v40 }
  0xe7   :  { %v129_v45 = vadd.f32 1.0, %v127_v41 }
  0xe8   :  { %v132_v46 = vmul.f32 %v130_v43, %v126_v42 }
  0xe9   :  { %v131_v47 = vmul.f32 %v129_v45, %v125_v44 }
  0xea   :  { %388 = vtanh.f32 %v132_v46 }
  0xeb   :  { %390 = vtanh.f32 %v131_v47 }
  0xf4   :  { %v389_v48 = vpop.eup %388 }
  0xf5   :  { %v391_v49 = vpop.eup %390  ;;  %v136_v50 = vmul.f32 0.5, %v389_v48 }
  0xf6   :  { %v135_v51 = vmul.f32 0.5, %v391_v49 }
  0xf7   :  { %v138_v52 = vadd.f32 0.5, %v136_v50 }
  0xf8   :  { %v137_v53 = vadd.f32 0.5, %v135_v51 }
  0xf9   :  { %v140_v55 = vmul.f32 %v138_v52, %v120_v35 }
  0xfa   :  { %v139_v54 = vmul.f32 %v137_v53, %v115_v37 }
  0xfc   :  { %341 = vmatprep.mubr.f32.mxu1 %v139_v54 }
  0xfd   :  { %342 = vmatmul.mubr.f32.vlgmr.msra.gmra.mrb[0].mxu1 %v140_v55 }
 0x1d0   :  { %v343_v58 = vpop.f32.mrb[0].mxu1 }
 0x1d1   :  { %v235_v59 = vadd.f32 %v343_v58, %v142_v56  ;;  %v225_v60 = vpop.f32.mrb[1].mxu1 }
 0x1d2   :  { %v234_v61 = vadd.f32 %v225_v60, %v141_v57 }
 0x1d3   :  { %237 = vst.msk [vmem:[#allocation2 + $0x8] sm:$0xff] %vm25_vm0, %v235_v59 }
 0x1d4   :  { %236 = vst.msk [vmem:[#allocation2] sm:$0xff] %vm25_vm0, %v234_v61 }
 0x1da   :  { %v242_v63 = vld [vmem:[#allocation2 + $0x8] sm:$0xff] }
 0x1db   :  { %v241_v0 = vld [vmem:[#allocation2] sm:$0xff]  ;;  %v251_v1 = vadd.f32 %v273_v62, %v242_v63 }
 0x1dc   :  { %v250_v2 = vadd.f32 %v273_v62, %v241_v0 }
 0x1dd   :  { %253 = vst.msk [vmem:[#allocation3 + $0x8] sm:$0xff] %vm25_vm0, %v251_v1 }
 0x1de   :  { %252 = vst.msk [vmem:[#allocation3] sm:$0xff] %vm25_vm0, %v250_v2 }
 0x1df   :  { %403 = shalt.err (!%p400_p4)
}
 0x1e0   :  { %s404_s15 = scalar_lea.hbm %s547_s5, 256 }
 0x1e1   :  { %p405_p5 = scmp.ne.s32.totalorder %s547_s5, %s404_s15  ;;  %p408_p6 = scmp.lt.u32.totalorder %s404_s15, %s547_s5 }
 0x1e3   :  { %p410_p7 = pnand %p408_p6, %p405_p5 }
 0x1e5   :  { %413 = shalt.err (!%p410_p7)
}
 0x1e6   :  { %s418_s19 = smov 128   ;;  %s419_s20 = smov 8  }
 0x1e7   :  { %265 = dma.vmem_to_hbm [thread:$0]  %s260_s12, 256, %s547_s5, [#allocation4], %s418_s19, %s418_s19, %s419_s20  }
 0x1e8   :  { %414 = dma.done.wait [#allocation4], 256  }
 0x1e9   :  { %415 = vsyncadd [#allocation4], 4294967040 }
 0x1ea   :  { %269 = vsyncpa [#allocation4], 1 }

</bundles_post_ra>
